<compile_context>
chip_gen: v6e
topology: v6e:2x2x1
jax: 0.10.0
libtpu: 0.0.40
codegen_flags: <defaults>
</compile_context>

<pallas_src>
import jax
import jax.numpy as jnp
from jax.experimental import pallas as pl
from jax.experimental.pallas import tpu as pltpu


# -----------------------------------------------------------------------------
# Fused Pallas kernel:  y = W2 @ gelu(W1 @ gelu(x) + b1) + b2   (per column)
# -----------------------------------------------------------------------------
def _composite_kernel(x_ref, w1_ref, b1_ref, w2_ref, b2_ref, y_ref):
    # x_ref : (C, tile_hw)  lane-dense tile of one batch element (batch squeezed)
    # w1_ref: (Ch, C)   b1_ref: (Ch, 1)
    # w2_ref: (C, Ch)   b2_ref: (C, 1)
    x = x_ref[...].astype(jnp.float32)
    h = jax.nn.gelu(x, approximate=True)                       # nonl (VPU/EUP)
    z1 = jnp.dot(w1_ref[...].astype(jnp.float32), h,           # MXU
                 preferred_element_type=jnp.float32) + b1_ref[...].astype(jnp.float32)
    h1 = jax.nn.gelu(z1, approximate=True)                     # mlp inner act
    y = jnp.dot(w2_ref[...].astype(jnp.float32), h1,           # MXU
                preferred_element_type=jnp.float32) + b2_ref[...].astype(jnp.float32)
    y_ref[...] = y.astype(y_ref.dtype)


# -----------------------------------------------------------------------------
# Tile selection: budget VMEM including hidden width + intermediates.
# -----------------------------------------------------------------------------
def _choose_tile(hw, batch, c, ch, elem_bytes):
    """Pick the lane tile (multiple of 128, or full HW if HW < 128) and a
    VMEM limit derived from the actual per-tile footprint."""
    # Per lane-column VMEM footprint:
    #   x tile double-buffered        : 2 * C  * elem_bytes
    #   y tile double-buffered        : 2 * C  * elem_bytes
    #   f32 intermediates x/gelu/y    : 2 * C  * 4
    #   f32 intermediates z1 / h1     : 2 * Ch * 4
    per_col = 4 * c * elem_bytes + (2 * c + 2 * ch) * 4
    budget = 32 << 20                                  # streaming budget
    max_cols = max(128, budget // per_col)
    max_cols = min(max_cols, 8192)                     # keep several grid steps

    if hw <= 128:
        tile = hw                                      # full-dim block allowed
    else:
        tile = min(hw, max_cols)
        # aim for >= 8 total grid steps when the problem is big enough
        want_hw_tiles = max(1, -(-8 // max(batch, 1)))  # ceil(8 / batch)
        if hw >= want_hw_tiles * 128:
            tile = min(tile, max(128, (hw // want_hw_tiles)))
        tile = max(128, (tile // 128) * 128)           # lane-dense multiple of 128

    weight_bytes = (ch * c * 2 + ch + c) * elem_bytes
    vmem_est = per_col * tile + 4 * weight_bytes       # + double-buffered weights
    vmem_limit = int(min(max(2 * vmem_est, 16 << 20), 48 << 20))
    return tile, vmem_limit


# -----------------------------------------------------------------------------
# composite.forward equivalent
# -----------------------------------------------------------------------------
def composite_forward(x, w1, b1, w2, b2):
    """y = mlp(nonl(x)); nonl = GELU, mlp = 1x1 conv(C->Ch) -> GELU -> 1x1 conv(Ch->C).

    x  : (B, C, H, W) NCHW
    w1 : (Ch, C),  b1 : (Ch,)
    w2 : (C, Ch),  b2 : (C,)
    """
    B, C, H, W = x.shape
    Ch = w1.shape[0]
    HW = H * W

    # Free view: merge trailing spatial dims (H*W is already the lane-dense
    # trailing axis in NCHW) — no transpose, no copy.
    x3 = x.reshape(B, C, HW)

    elem_bytes = jnp.dtype(x.dtype).itemsize
    tile_hw, vmem_limit = _choose_tile(HW, B, C, Ch, elem_bytes)
    grid = (B, pl.cdiv(HW, tile_hw))

    x_spec = pl.BlockSpec((pl.Squeezed(), C, tile_hw), lambda b, i: (b, 0, i))
    y_spec = pl.BlockSpec((pl.Squeezed(), C, tile_hw), lambda b, i: (b, 0, i))
    w1_spec = pl.BlockSpec((Ch, C), lambda b, i: (0, 0))
    b1_spec = pl.BlockSpec((Ch, 1), lambda b, i: (0, 0))
    w2_spec = pl.BlockSpec((C, Ch), lambda b, i: (0, 0))
    b2_spec = pl.BlockSpec((C, 1), lambda b, i: (0, 0))

    y3 = pl.pallas_call(
        _composite_kernel,
        out_shape=jax.ShapeDtypeStruct((B, C, HW), x.dtype),
        grid=grid,
        in_specs=[x_spec, w1_spec, b1_spec, w2_spec, b2_spec],
        out_specs=y_spec,
        compiler_params=pltpu.CompilerParams(
            dimension_semantics=("parallel", "parallel"),  # megacore shards both
            vmem_limit_bytes=vmem_limit,
        ),
    )(x3, w1, b1.reshape(Ch, 1), w2, b2.reshape(C, 1))

    return y3.reshape(B, C, H, W)


# -----------------------------------------------------------------------------
# main
# -----------------------------------------------------------------------------
if __name__ == "__main__":
    B, C, H, W = 2, 4, 16, 16
    hidden = 32

    key = jax.random.PRNGKey(0)
    kx, k1, kb1, k2, kb2 = jax.random.split(key, 5)

    x = jax.random.normal(kx, (B, C, H, W), dtype=jnp.float32)
    w1 = 0.1 * jax.random.normal(k1, (hidden, C), dtype=jnp.float32)
    b1 = 0.1 * jax.random.normal(kb1, (hidden,), dtype=jnp.float32)
    w2 = 0.1 * jax.random.normal(k2, (C, hidden), dtype=jnp.float32)
    b2 = 0.1 * jax.random.normal(kb2, (C,), dtype=jnp.float32)

    fwd = jax.jit(composite_forward)
    y = jax.block_until_ready(fwd(x, w1, b1, w2, b2))

    # Pure-JAX reference: mlp(nonl(x)) with 1x1 convs over the channel dim.
    h = jax.nn.gelu(x, approximate=True)
    z1 = jnp.einsum("oc,bchw->bohw", w1, h) + b1[None, :, None, None]
    h1 = jax.nn.gelu(z1, approximate=True)
    y_ref = jnp.einsum("co,bohw->bchw", w2, h1) + b2[None, :, None, None]

    assert y.shape == (B, C, H, W)
    assert jnp.allclose(y, y_ref, atol=1e-5, rtol=1e-5)

    print("KERNEL_OK")
</pallas_src>

<mosaic_0001>
module attributes {stable_mosaic.version = 11 : i64} {
  func.func @_composite_kernel(%arg0: i32, %arg1: i32, %arg2: memref<1x4x256xf32, #tpu.memory_space<vmem>>, %arg3: memref<32x4xf32, #tpu.memory_space<vmem>>, %arg4: memref<32x1xf32, #tpu.memory_space<vmem>>, %arg5: memref<4x32xf32, #tpu.memory_space<vmem>>, %arg6: memref<4x1xf32, #tpu.memory_space<vmem>>, %arg7: memref<1x4x256xf32, #tpu.memory_space<vmem>>) attributes {dimension_semantics = [#tpu.dimension_semantics<parallel>, #tpu.dimension_semantics<parallel>], iteration_bounds = array<i64: 2, 1>, scalar_prefetch = 0 : i64, scratch_operands = 0 : i64, tpu.core_type = #tpu.core_type<tc>, window_params = [{transform_indices = @transform_0, window_bounds = array<i64: 1, 4, 256>}, {pipeline_mode = #tpu.pipeline_mode<synchronous>, transform_indices = @transform_1, window_bounds = array<i64: 32, 4>}, {pipeline_mode = #tpu.pipeline_mode<synchronous>, transform_indices = @transform_2, window_bounds = array<i64: 32, 1>}, {pipeline_mode = #tpu.pipeline_mode<synchronous>, transform_indices = @transform_3, window_bounds = array<i64: 4, 32>}, {pipeline_mode = #tpu.pipeline_mode<synchronous>, transform_indices = @transform_4, window_bounds = array<i64: 4, 1>}, {transform_indices = @transform_5, window_bounds = array<i64: 1, 4, 256>}]} {
    %c0 = arith.constant 0 : index
    %c0_0 = arith.constant 0 : index
    %c0_1 = arith.constant 0 : index
    %0 = vector.load %arg2[%c0, %c0_0, %c0_1] : memref<1x4x256xf32, #tpu.memory_space<vmem>>, vector<1x4x256xf32>
    %1 = vector.shape_cast %0 : vector<1x4x256xf32> to vector<4x256xf32>
    %2 = arith.mulf %1, %1 : vector<4x256xf32>
    %3 = arith.mulf %1, %2 : vector<4x256xf32>
    %cst = arith.constant 4.471500e-02 : f32
    %4 = vector.broadcast %cst : f32 to vector<4x256xf32>
    %5 = arith.mulf %4, %3 : vector<4x256xf32>
    %6 = arith.addf %1, %5 : vector<4x256xf32>
    %cst_2 = arith.constant 0.797884583 : f32
    %7 = vector.broadcast %cst_2 : f32 to vector<4x256xf32>
    %8 = arith.mulf %7, %6 : vector<4x256xf32>
    %9 = math.tanh %8 : vector<4x256xf32>
    %cst_3 = arith.constant 1.000000e+00 : f32
    %10 = vector.broadcast %cst_3 : f32 to vector<4x256xf32>
    %11 = arith.addf %10, %9 : vector<4x256xf32>
    %cst_4 = arith.constant 5.000000e-01 : f32
    %12 = vector.broadcast %cst_4 : f32 to vector<4x256xf32>
    %13 = arith.mulf %12, %11 : vector<4x256xf32>
    %14 = arith.mulf %1, %13 : vector<4x256xf32>
    %c0_5 = arith.constant 0 : index
    %c0_6 = arith.constant 0 : index
    %15 = vector.load %arg3[%c0_5, %c0_6] : memref<32x4xf32, #tpu.memory_space<vmem>>, vector<32x4xf32>
    %cst_7 = arith.constant dense<0.000000e+00> : vector<32x256xf32>
    %16 = tpu.matmul %15, %14, %cst_7 {dimension_numbers = #tpu.dot_dimension_numbers<[1], [0], [0], [1], [0, 0, 1, 1], [], []>} : vector<32x4xf32>, vector<4x256xf32>, vector<32x256xf32> -> vector<32x256xf32>
    %c0_8 = arith.constant 0 : index
    %c0_9 = arith.constant 0 : index
    %17 = vector.load %arg4[%c0_8, %c0_9] : memref<32x1xf32, #tpu.memory_space<vmem>>, vector<32x1xf32>
    %18 = vector.broadcast %17 : vector<32x1xf32> to vector<32x256xf32>
    %19 = arith.addf %16, %18 : vector<32x256xf32>
    %20 = arith.mulf %19, %19 : vector<32x256xf32>
    %21 = arith.mulf %19, %20 : vector<32x256xf32>
    %cst_10 = arith.constant 4.471500e-02 : f32
    %22 = vector.broadcast %cst_10 : f32 to vector<32x256xf32>
    %23 = arith.mulf %22, %21 : vector<32x256xf32>
    %24 = arith.addf %19, %23 : vector<32x256xf32>
    %cst_11 = arith.constant 0.797884583 : f32
    %25 = vector.broadcast %cst_11 : f32 to vector<32x256xf32>
    %26 = arith.mulf %25, %24 : vector<32x256xf32>
    %27 = math.tanh %26 : vector<32x256xf32>
    %cst_12 = arith.constant 1.000000e+00 : f32
    %28 = vector.broadcast %cst_12 : f32 to vector<32x256xf32>
    %29 = arith.addf %28, %27 : vector<32x256xf32>
    %cst_13 = arith.constant 5.000000e-01 : f32
    %30 = vector.broadcast %cst_13 : f32 to vector<32x256xf32>
    %31 = arith.mulf %30, %29 : vector<32x256xf32>
    %32 = arith.mulf %19, %31 : vector<32x256xf32>
    %c0_14 = arith.constant 0 : index
    %c0_15 = arith.constant 0 : index
    %33 = vector.load %arg5[%c0_14, %c0_15] : memref<4x32xf32, #tpu.memory_space<vmem>>, vector<4x32xf32>
    %cst_16 = arith.constant dense<0.000000e+00> : vector<4x256xf32>
    %34 = tpu.matmul %33, %32, %cst_16 {dimension_numbers = #tpu.dot_dimension_numbers<[1], [0], [0], [1], [0, 0, 1, 1], [], []>} : vector<4x32xf32>, vector<32x256xf32>, vector<4x256xf32> -> vector<4x256xf32>
    %c0_17 = arith.constant 0 : index
    %c0_18 = arith.constant 0 : index
    %35 = vector.load %arg6[%c0_17, %c0_18] : memref<4x1xf32, #tpu.memory_space<vmem>>, vector<4x1xf32>
    %36 = vector.broadcast %35 : vector<4x1xf32> to vector<4x256xf32>
    %37 = arith.addf %34, %36 : vector<4x256xf32>
    %c0_19 = arith.constant 0 : index
    %c0_20 = arith.constant 0 : index
    %c0_21 = arith.constant 0 : index
    %38 = vector.load %arg7[%c0_19, %c0_20, %c0_21] : memref<1x4x256xf32, #tpu.memory_space<vmem>>, vector<1x4x256xf32>
    %39 = vector.shape_cast %38 : vector<1x4x256xf32> to vector<4x256xf32>
    %40 = vector.shape_cast %37 : vector<4x256xf32> to vector<1x4x256xf32>
    tpu.vector_store %arg7[%c0_19, %c0_20, %c0_21], %40 {strides = array<i32>} : memref<1x4x256xf32, #tpu.memory_space<vmem>>, vector<1x4x256xf32>,
    return
  }
  func.func @transform_0(%arg0: i32, %arg1: i32) -> (i32, i32, i32) {
    %c0_i32 = arith.constant 0 : i32
    %c0_i32_0 = arith.constant 0 : i32
    return %arg0, %c0_i32, %arg1 : i32, i32, i32
  }
  func.func @transform_1(%arg0: i32, %arg1: i32) -> (i32, i32) {
    %c0_i32 = arith.constant 0 : i32
    %c0_i32_0 = arith.constant 0 : i32
    %c0_i32_1 = arith.constant 0 : i32
    return %c0_i32, %c0_i32_0 : i32, i32
  }
  func.func @transform_2(%arg0: i32, %arg1: i32) -> (i32, i32) {
    %c0_i32 = arith.constant 0 : i32
    %c0_i32_0 = arith.constant 0 : i32
    %c0_i32_1 = arith.constant 0 : i32
    return %c0_i32, %c0_i32_0 : i32, i32
  }
  func.func @transform_3(%arg0: i32, %arg1: i32) -> (i32, i32) {
    %c0_i32 = arith.constant 0 : i32
    %c0_i32_0 = arith.constant 0 : i32
    %c0_i32_1 = arith.constant 0 : i32
    return %c0_i32, %c0_i32_0 : i32, i32
  }
  func.func @transform_4(%arg0: i32, %arg1: i32) -> (i32, i32) {
    %c0_i32 = arith.constant 0 : i32
    %c0_i32_0 = arith.constant 0 : i32
    %c0_i32_1 = arith.constant 0 : i32
    return %c0_i32, %c0_i32_0 : i32, i32
  }
  func.func @transform_5(%arg0: i32, %arg1: i32) -> (i32, i32, i32) {
    %c0_i32 = arith.constant 0 : i32
    %c0_i32_0 = arith.constant 0 : i32
    return %arg0, %c0_i32, %arg1 : i32, i32, i32
  }
}

</mosaic_0001>

<bundles_post_ra>
// kernel: composite_forward.1
= control target key start
LH: loop header
LB: loop body
LE: loop exit
PB: predicated region body
PF: predicated region fallthrough
CT: control target
= control target key end

     0   :  { %s779_s18 = smov 0   ;;  %s781_s19 = smov 0   ;;  %s891_s0 = inlined_call_operand.vmem [shape: f32[2,4,256], index: 0, kind: input, shape index: {}]   ;;  %s892_s1 = inlined_call_operand.vmem [shape: f32[32,4], index: 1, kind: input, shape index: {}]   ;;  %s893_s2 = inlined_call_operand.vmem [shape: f32[32,1], index: 2, kind: input, shape index: {}]   ;;  %s894_s3 = inlined_call_operand.vmem [shape: f32[4,32], index: 3, kind: input, shape index: {}]   ;;  %s895_s4 = inlined_call_operand.vmem [shape: f32[4,1], index: 4, kind: input, shape index: {}]   ;;  %s896_s5 = inlined_call_operand.vmem [shape: f32[2,4,256], index: 5, kind: output, shape index: {}]  }
   0x1   :  { %s783_s20 = smov 0  }
   0x2 LB: > { %s27_s21 = sadd.s32 1, %s741_s19  ;;  %p661_p0 = scmp.ge.s32.totalorder %s745_s20, 1  ;;  %s745_s20 = sphi %s783_s20, %s15_s20   ;;  %s741_s19 = sphi %s781_s19, %s898_s19   ;;  %s737_s18 = sphi %s779_s18, %s897_s18  }
   0x3   : > { %p29_p1 = scmp.ge.s32.totalorder %s27_s21, 2  ;;  %p208_p2 = scmp.lt.s32.totalorder %s745_s20, 3 }
   0x5   : > { %s900_s21 = smov (%p29_p1, %s27_s21), 0  ;;  %p209_p3 = pnand %p661_p0, %p208_p2 }
   0x6   : > { %p245_p4 = scmp.lt.s32.totalorder (!%p209_p3), %s737_s18, 1 }
   0x7   : > { %212 = sbr.rel (%p209_p3) target bundleno = 497 (0x1f1), region = 40 }
   0xc   : > { %v747_v0 = vmov 0.0   ;;  %v279_v1 = vld [vmem:[%s893_s2 + $0x8] sm:$0xff]  ;;  %s902_s18 = smov (!%p245_p4, %s737_s18), 1  ;;  %v748_v2 = vmov 0   ;;  %v281_v3 = vld [vmem:[%s893_s2 + $0x18] sm:$0xff]  ;;  %v278_v4 = vld [vmem:[%s893_s2] sm:$0xff] }
   0xd   : > { %386 = vmatprep.mubr.f32.mxu0 %v747_v0  ;;  %558 = vmatprep.mubr.f32.mxu1 %v747_v0  ;;  %s675_s26 = sshll.u32 %s902_s18, 3  ;;  %v280_v5 = vld [vmem:[%s893_s2 + $0x10] sm:$0xff]  ;;  %v484_v8 = vld [vmem:[%s895_s4] sm:$0xf]  ;;  %vm317_vm0 = vcmask 1043456   ;;  %vm304_vm1 = vcmask 31744  }
   0xe   : > { %704 = vset.pattern.permute.xlu1 %v748_v2  ;;  %703 = vset.pattern.permute.xlu0 %v748_v2  ;;  %s252_s8 = scalar_lea.vmem %s891_s0, %s675_s26  ;;  %v274_v18 = vld [vmem:[%s892_s1] sm:$0xff]  ;;  %v275_v19 = vld [vmem:[%s892_s1 + $0x8] sm:$0xff]  ;;  %v276_v20 = vld [vmem:[%s892_s1 + $0x10] sm:$0xff]  ;;  %vm490_vm2 = vcmask 261120   ;;  %s262_s28 = scalar_lea.vmem %s896_s5, %s675_s26 }
   0xf   : > { %289 = vperm.xlu1 %704, %v279_v1   ;;  %299 = vperm.xlu0 %703, %v281_v3   ;;  %v264_v6 = vld [vmem:[%s252_s8] sm:$0xff]  ;;  %v277_v21 = vld [vmem:[%s892_s1 + $0x18] sm:$0xff] }
  0x10   : > { %v265_v7 = vmul.f32 %v264_v6, %v264_v6 }
  0x12   : > { %v266_v9 = vmul.f32 %v265_v7, %v264_v6 }
  0x13   : > { %284 = vperm.xlu1 %704, %v278_v4   ;;  %294 = vperm.xlu0 %703, %v280_v5  }
  0x14   : > { %v267_v10 = vmul.f32 0.044715, %v266_v9 }
  0x16   : > { %v268_v11 = vadd.f32 %v267_v10, %v264_v6 }
  0x17   : > { %487 = vperm.xlu0 %703, %v484_v8  }
  0x18   : > { %v269_v12 = vmul.f32 0.7978846, %v268_v11 }
  0x1a   : > { %705 = vtanh.f32 %v269_v12 }
  0x27   : > { %v706_v13 = vpop.eup %705 }
  0x28   : > { %v271_v14 = vadd.f32 1.0, %v706_v13 }
  0x2a   : > { %v272_v15 = vmul.f32 0.5, %v271_v14 }
  0x2c   : > { %v273_v16 = vmul.f32 %v272_v15, %v264_v6 }
  0x2e   : > { %v303_v17 = vcombine.high %v273_v16, %v273_v16 }
  0x30   : > { %666 = vmatprep.subr.msk.mxu0 %vm317_vm0, %v303_v17 }
  0x31   : > { %667 = vmatpush1.msk.msra.mxu0 %vm317_vm0, %v273_v16 }
  0x32   : > { %668 = vmatmul.mubr.msk.f32.vlgmr.msra.gmra.mxu0 %vm304_vm1, %v274_v18 }
  0x33   : > { %392 = vmatprep.mubr.f32.mxu0 %v747_v0 }
  0x36   : > { %669 = vmatmul.mubr.msk.f32.gmra.mxu0 %vm304_vm1, %v275_v19 }
  0x37   : > { %398 = vmatprep.mubr.f32.mxu0 %v747_v0 }
  0x3a   : > { %670 = vmatmul.mubr.msk.f32.gmra.mxu0 %vm304_vm1, %v276_v20 }
  0x3b   : > { %404 = vmatprep.mubr.f32.mxu0 %v747_v0 }
  0x3e   : > { %671 = vmatmul.mubr.msk.f32.gmra.mxu0 %vm304_vm1, %v277_v21 }
  0x8a   : > { %v290_v22 = vpop.permute.xlu1 %289  ;;  %v300_v25 = vpop.permute.xlu0 %299 }
  0x8e   : > { %v285_v24 = vpop.permute.xlu1 %284  ;;  %v295_v36 = vpop.permute.xlu0 %294 }
  0xf2   : > { %v388_v23 = vpop.f32.mrf.mxu0 }
  0xf3   : > { %v834_v28 = vadd.f32 %v388_v23, %v285_v24 }
  0xf4   : > { %v390_v26 = vpop.f32.mrf.mxu0 }
  0xf5   : > { %v832_v27 = vadd.f32 %v390_v26, %v285_v24  ;;  %v411_v37 = vmul.f32 %v834_v28, %v834_v28 }
  0xf6   : > { %v394_v29 = vpop.f32.mrf.mxu0 }
  0xf7   : > { %v412_v30 = vmul.f32 %v832_v27, %v832_v27  ;;  %v838_v31 = vadd.f32 %v394_v29, %v290_v22  ;;  %v419_v46 = vmul.f32 %v411_v37, %v834_v28 }
  0xf8   : > { %v396_v32 = vpop.f32.mrf.mxu0 }
  0xf9   : > { %v420_v33 = vmul.f32 %v412_v30, %v832_v27  ;;  %v413_v34 = vmul.f32 %v838_v31, %v838_v31  ;;  %v843_v35 = vadd.f32 %v396_v32, %v290_v22  ;;  %v427_v58 = vmul.f32 0.044715, %v419_v46 }
  0xfa   : > { %v400_v38 = vpop.f32.mrf.mxu0 }
  0xfb   : > { %v428_v39 = vmul.f32 0.044715, %v420_v33  ;;  %v421_v40 = vmul.f32 %v413_v34, %v838_v31  ;;  %v414_v41 = vmul.f32 %v843_v35, %v843_v35  ;;  %v850_v42 = vadd.f32 %v400_v38, %v295_v36 }
  0xfc   : > { %v402_v43 = vpop.f32.mrf.mxu0  ;;  %v435_v6 = vadd.f32 %v427_v58, %v834_v28 }
  0xfd   : > { %v429_v44 = vmul.f32 0.044715, %v421_v40  ;;  %v422_v45 = vmul.f32 %v414_v41, %v843_v35  ;;  %v415_v47 = vmul.f32 %v850_v42, %v850_v42  ;;  %v856_v48 = vadd.f32 %v402_v43, %v295_v36 }
  0xfe   : > { %v406_v49 = vpop.f32.mrf.mxu0  ;;  %v436_v50 = vadd.f32 %v428_v39, %v832_v27  ;;  %v443_v15 = vmul.f32 0.7978846, %v435_v6 }
  0xff   : > { %v430_v51 = vmul.f32 0.044715, %v422_v45  ;;  %v437_v52 = vadd.f32 %v429_v44, %v838_v31  ;;  %v423_v53 = vmul.f32 %v415_v47, %v850_v42  ;;  %v416_v54 = vmul.f32 %v856_v48, %v856_v48 }
 0x100   : > { %v407_v55 = vadd.f32 %v406_v49, %v300_v25  ;;  %v408_v56 = vpop.f32.mrf.mxu0  ;;  %v444_v62 = vmul.f32 0.7978846, %v436_v50 }
 0x101   : > { %v409_v57 = vadd.f32 %v408_v56, %v300_v25  ;;  %v431_v59 = vmul.f32 0.044715, %v423_v53  ;;  %v424_v60 = vmul.f32 %v416_v54, %v856_v48  ;;  %v438_v63 = vadd.f32 %v430_v51, %v843_v35 }
 0x102   : > { %v417_v61 = vmul.f32 %v407_v55, %v407_v55  ;;  %v445_v1 = vmul.f32 0.7978846, %v437_v52  ;;  %707 = vtanh.f32 %v444_v62 }
 0x103   : > { %v418_v0 = vmul.f32 %v409_v57, %v409_v57  ;;  %v439_v2 = vadd.f32 %v431_v59, %v850_v42  ;;  %v432_v3 = vmul.f32 0.044715, %v424_v60  ;;  %v446_v10 = vmul.f32 0.7978846, %v438_v63 }
 0x104   : > { %v425_v4 = vmul.f32 %v417_v61, %v407_v55  ;;  %709 = vtanh.f32 %v445_v1 }
 0x105   : > { %v426_v5 = vmul.f32 %v418_v0, %v409_v57  ;;  %v447_v7 = vmul.f32 0.7978846, %v439_v2  ;;  %v440_v8 = vadd.f32 %v432_v3, %v856_v48 }
 0x106   : > { %v433_v9 = vmul.f32 0.044715, %v425_v4 }
 0x107   : > { %v434_v11 = vmul.f32 0.044715, %v426_v5  ;;  %v448_v12 = vmul.f32 0.7978846, %v440_v8  ;;  %711 = vtanh.f32 %v447_v7 }
 0x108   : > { %v441_v13 = vadd.f32 %v433_v9, %v407_v55 }
 0x109   : > { %v442_v14 = vadd.f32 %v434_v11, %v409_v57  ;;  %713 = vtanh.f32 %v448_v12 }
 0x10a   : > { %v449_v16 = vmul.f32 0.7978846, %v441_v13  ;;  %715 = vtanh.f32 %v446_v10 }
 0x10b   : > { %v450_v17 = vmul.f32 0.7978846, %v442_v14 }
 0x10c   : > { %717 = vtanh.f32 %v449_v16 }
 0x10d   : > { %719 = vtanh.f32 %v450_v17 }
 0x10e   : > { %721 = vtanh.f32 %v443_v15 }
 0x10f   : > { %v708_v18 = vpop.eup %707 }
 0x110   : > { %v460_v39 = vadd.f32 1.0, %v708_v18 }
 0x111   : > { %v710_v19 = vpop.eup %709 }
 0x112   : > { %v461_v36 = vadd.f32 1.0, %v710_v19  ;;  %v468_v49 = vmul.f32 0.5, %v460_v39 }
 0x114   : > { %v712_v20 = vpop.eup %711  ;;  %v469_v46 = vmul.f32 0.5, %v461_v36  ;;  %v476_v54 = vmul.f32 %v468_v49, %v832_v27 }
 0x115   : > { %v463_v29 = vadd.f32 1.0, %v712_v20 }
 0x116   : > { %v714_v21 = vpop.eup %713  ;;  %v477_v53 = vmul.f32 %v469_v46, %v838_v31 }
 0x117   : > { %v716_v22 = vpop.eup %715  ;;  %v464_v24 = vadd.f32 1.0, %v714_v21  ;;  %v471_v40 = vmul.f32 0.5, %v463_v29 }
 0x118   : > { %v462_v33 = vadd.f32 1.0, %v716_v22 }
 0x119   : > { %v718_v23 = vpop.eup %717  ;;  %v472_v38 = vmul.f32 0.5, %v464_v24  ;;  %v479_v50 = vmul.f32 %v471_v40, %v850_v42 }
 0x11a   : > { %v720_v25 = vpop.eup %719  ;;  %v465_v26 = vadd.f32 1.0, %v718_v23  ;;  %v470_v44 = vmul.f32 0.5, %v462_v33 }
 0x11b   : > { %v722_v30 = vpop.eup %721  ;;  %v466_v32 = vadd.f32 1.0, %v720_v25  ;;  %v480_v47 = vmul.f32 %v472_v38, %v856_v48  ;;  %v483_v48 = vld [vmem:[%s894_s3] sm:$0xf] }
 0x11c   : > { %v473_v34 = vmul.f32 0.5, %v465_v26  ;;  %v459_v41 = vadd.f32 1.0, %v722_v30  ;;  %v478_v52 = vmul.f32 %v470_v44, %v843_v35  ;;  %v488_v35 = vpop.permute.xlu0 %487 }
 0x11d   : > { %v474_v37 = vmul.f32 0.5, %v466_v32 }
 0x11e   : > { %v481_v45 = vmul.f32 %v473_v34, %v407_v55  ;;  %v467_v51 = vmul.f32 0.5, %v459_v41 }
 0x11f   : > { %v482_v43 = vmul.f32 %v474_v37, %v409_v57 }
 0x120   : > { %v475_v55 = vmul.f32 %v467_v51, %v834_v28 }
 0x121   : > { %518 = vmatprep.subr.mxu1 %v482_v43 }
 0x122   : > { %519 = vmatpush1.msra.mxu1 %v481_v45 }
 0x123   : > { %520 = vmatprep.subr.mxu1 %v480_v47 }
 0x124   : > { %521 = vmatpush1.msra.mxu1 %v479_v50 }
 0x125   : > { %522 = vmatprep.subr.mxu1 %v478_v52 }
 0x126   : > { %523 = vmatpush1.msra.mxu1 %v477_v53 }
 0x127   : > { %524 = vmatprep.subr.mxu1 %v476_v54 }
 0x128   : > { %525 = vmatpush1.msra.mxu1 %v475_v55 }
 0x129   : > { %672 = vmatmul.mubr.msk.f32.vlgmr.msra.gmra.mxu1 %vm490_vm2, %v483_v48 }
 0x1e9   : > { %v560_v42 = vpop.f32.mrf.mxu1 }
 0x1ea   : > { %v561_v57 = vadd.f32 %v560_v42, %v488_v35 }
 0x1eb   : > { %v562_v56 = vpop.f32.mrf.mxu1 }
 0x1ec   : > { %v563_v58 = vadd.f32 %v562_v56, %v488_v35 }
 0x1ee   : > { %v567_v27 = vcombine.low %v561_v57, %v563_v58 }
 0x1f0   : > { %569 = vst [vmem:[%s262_s28] sm:$0xff] %v567_v27 }
 0x1f1 PF: > { %s15_s20 = sadd.s32 1, %s745_s20   ;;  %s897_s18 = smov %s741_s19 }
 0x1f2   : > { %p12_p5 = scmp.ge.s32.totalorder %s15_s20, 4   ;;  %s898_s19 = smov %s900_s21 }
 0x1f4   :  { %14 = sbr.rel (!%p12_p5) target bundleno = 2 (0x2), region = 70 }

</bundles_post_ra>
